<compile_context>
chip_gen: v6e
topology: v6e:2x2x1
jax: 0.10.0
libtpu: 0.0.40
codegen_flags: <defaults>
</compile_context>

<pallas_src>
import math
from functools import partial

import jax
import jax.numpy as jnp
from jax.experimental import pallas as pl
from jax.experimental.pallas import tpu as pltpu


# ---------------------------------------------------------------------------
# Kernels
# ---------------------------------------------------------------------------
def _conv_wide_kernel(x_ref, w_ref, b_ref, o_ref, *, k, Wc, Wo, tho):
    """stride == 1: k^2 full-window matmuls, static shift-accumulate, trim.

    x_ref : (1, 1, Cin, L)      bf16 flattened padded row window (+ slack)
    w_ref : (k*k, Cout, Cin)    bf16 per-tap weights (resident)
    b_ref : (Cout, 1)           f32 bias (resident)
    o_ref : (1, Cout, tho*Wo)   f32 lane-dense output block
    """
    cout = o_ref.shape[1]
    bf = x_ref[0, 0]                                      # (Cin, L)
    acc = jnp.zeros((cout, tho * Wc), jnp.float32)
    for dy in range(k):
        for dx in range(k):
            z = jnp.dot(w_ref[dy * k + dx], bf,
                        preferred_element_type=jnp.float32)   # (Cout, L)
            sh = dy * Wc + dx                             # static tap shift
            acc = acc + z[:, sh:sh + tho * Wc]
    # Trim the 2*pad junk columns of every row with static slices + one
    # concat (no value reshapes), add bias, store the whole block densely.
    rows = [acc[:, j * Wc:j * Wc + Wo] for j in range(tho)]
    out = jnp.concatenate(rows, axis=1) + b_ref[...]      # (Cout, tho*Wo)
    o_ref[0, :, :] = out.astype(o_ref.dtype)


def _conv_rows_kernel(x_ref, w_ref, b_ref, o_ref, *, k, stride, Wc, Wq, Wo,
                      tho):
    """stride >= 2: one output row at a time.  The wrapper stores each input
    row in column-phase-major order, so every tap needs only a contiguous
    static slice of length Wo (no strided loads)."""
    cout = o_ref.shape[1]
    rows = []
    for j in range(tho):
        acc = jnp.zeros((cout, Wo), jnp.float32)
        for dy in range(k):
            row_base = (stride * j + dy) * Wc
            for dx in range(k):
                base = row_base + (dx % stride) * Wq + dx // stride
                col = x_ref[0, 0, :, pl.ds(base, Wo)]     # (Cin, Wo)
                acc = acc + jnp.dot(w_ref[dy * k + dx], col,
                                    preferred_element_type=jnp.float32)
        rows.append(acc)
    out = jnp.concatenate(rows, axis=1) + b_ref[...]      # (Cout, tho*Wo)
    o_ref[0, :, :] = out.astype(o_ref.dtype)


# ---------------------------------------------------------------------------
# Tiling helpers
# ---------------------------------------------------------------------------
def _vmem_capacity_bytes():
    try:
        cap = getattr(pltpu.get_tpu_info(), "vmem_capacity_bytes", None)
        if cap:
            return int(cap)
    except Exception:
        pass
    return 64 * 1024 * 1024      # v7x per-TensorCore physical VMEM (smallest)


def _choose_row_tile(B, Ho, Wo, Cin, Cout, Wc, k, stride, itemsize, budget):
    """Largest output-row tile THo that (a) divides Ho, (b) keeps the output
    block lane dim a multiple of 128 (or the full Ho*Wo plane), (c) fits the
    VMEM budget, (d) leaves enough grid steps for pipelining / megacore."""
    def need(tho):
        R = stride * (tho - 1) + k
        L = R * Wc + k
        return int(1.2 * (2 * Cin * L * itemsize              # window x2 bufs
                          + 2 * k * k * Cout * Cin * itemsize  # taps (+hidden buf)
                          + 2 * Cout * 4                       # bias (+hidden buf)
                          + 2 * Cout * tho * Wo * 4            # out block x2 bufs
                          + 4 * Cout * L * 4))                 # acc/z/trim temps

    cands = [t for t in range(1, Ho + 1)
             if Ho % t == 0 and ((t * Wo) % 128 == 0 or t == Ho)
             and need(t) <= budget]
    if not cands:
        cands = [Ho]             # last resort; vmem_limit is raised anyway
    for min_steps in (8, 4, 2, 1):
        good = [t for t in cands if B * (Ho // t) >= min_steps]
        if good:
            return max(good)
    return max(cands)


# ---------------------------------------------------------------------------
# ConvLayer.forward
# ---------------------------------------------------------------------------
def conv_layer(x, weight, bias, stride, *, compute_dtype=jnp.bfloat16):
    """ReflectionPad2d(k//2) + Conv2d(kernel_size=k, stride=stride), NCHW.

    x: (B, Cin, H, W) f32; weight: (Cout, Cin, k, k); bias: (Cout,)
    returns: (B, Cout, Ho, Wo) f32
    """
    B, Cin, H, W = x.shape
    Cout, _, k, _ = weight.shape
    s = int(stride)
    p = k // 2
    Hp, Wp = H + 2 * p, W + 2 * p
    Ho = (Hp - k) // s + 1
    Wo = (Wp - k) // s + 1

    itemsize = jnp.dtype(compute_dtype).itemsize
    cap = _vmem_capacity_bytes()
    budget = min(cap // 3, 32 * 1024 * 1024)
    vmem_limit = min(max(cap * 3 // 4, 32 * 1024 * 1024), 48 * 1024 * 1024)

    # Column-phase-major row width (identity when stride == 1).
    Wq = -(-Wp // s)
    Wc = s * Wq

    tho = _choose_row_tile(B, Ho, Wo, Cin, Cout, Wc, k, s, itemsize, budget)
    T = Ho // tho
    R = s * (tho - 1) + k                 # input rows per window
    L = R * Wc + k                        # + slack so tap shifts never run off

    # ---- glue: one pass over the activation (fused by XLA) -----------------
    xp = jnp.pad(x, ((0, 0), (0, 0), (p, p), (p, p)), mode="reflect")
    if s > 1:                             # phase-major columns for stride>1
        xp = jnp.pad(xp, ((0, 0), (0, 0), (0, 0), (0, Wc - Wp)))
        xp = xp.reshape(B, Cin, Hp, Wq, s)
        xp = jnp.transpose(xp, (0, 1, 2, 4, 3)).reshape(B, Cin, Hp, Wc)
    xp = xp.astype(compute_dtype)
    # Overlapping row windows (overlap = k - s rows between adjacent tiles).
    xr = jnp.stack([xp[:, :, t * s * tho:t * s * tho + R, :] for t in range(T)],
                   axis=1)                                # (B, T, Cin, R, Wc)
    xr = xr.reshape(B, T, Cin, R * Wc)
    xr = jnp.pad(xr, ((0, 0), (0, 0), (0, 0), (0, L - R * Wc)))

    # Per-tap weights (k*k, Cout, Cin) and bias (Cout, 1).
    wtaps = jnp.transpose(weight, (2, 3, 0, 1)).reshape(k * k, Cout, Cin)
    wtaps = wtaps.astype(compute_dtype)
    bias2d = bias.astype(jnp.float32).reshape(Cout, 1)

    if s == 1:
        kern = partial(_conv_wide_kernel, k=k, Wc=Wc, Wo=Wo, tho=tho)
    else:
        kern = partial(_conv_rows_kernel, k=k, stride=s, Wc=Wc, Wq=Wq, Wo=Wo,
                       tho=tho)

    out = pl.pallas_call(
        kern,
        out_shape=jax.ShapeDtypeStruct((B, Cout, Ho * Wo), jnp.float32),
        grid=(B, T),
        in_specs=[
            pl.BlockSpec((1, 1, Cin, L), lambda b, t: (b, t, 0, 0)),   # stream
            pl.BlockSpec((k * k, Cout, Cin), lambda b, t: (0, 0, 0)),  # resident
            pl.BlockSpec((Cout, 1), lambda b, t: (0, 0)),              # resident
        ],
        out_specs=pl.BlockSpec((1, Cout, tho * Wo), lambda b, t: (b, 0, t)),
        compiler_params=pltpu.CompilerParams(
            dimension_semantics=("parallel", "parallel"),
            vmem_limit_bytes=int(vmem_limit)),
    )(xr, wtaps, bias2d)

    return out.reshape(B, Cout, Ho, Wo)   # layout-free reshape, stays NCHW


def conv_layer_ref(x, weight, bias, stride):
    """Plain-XLA f32 reference for validation."""
    k = weight.shape[-1]
    p = k // 2
    xp = jnp.pad(x, ((0, 0), (0, 0), (p, p), (p, p)), mode="reflect")
    y = jax.lax.conv_general_dilated(
        xp, weight, window_strides=(stride, stride), padding="VALID",
        dimension_numbers=("NCHW", "OIHW", "NCHW"))
    return y + bias[None, :, None, None]


if __name__ == "__main__":
    key = jax.random.PRNGKey(0)
    kx, kw, kb = jax.random.split(key, 3)

    B, Cin, H, W = 2, 4, 16, 16
    Cout, ksize = 8, 3
    bound = 1.0 / math.sqrt(Cin * ksize * ksize)   # PyTorch Conv2d default init
    x = jax.random.normal(kx, (B, Cin, H, W), jnp.float32)
    w = jax.random.uniform(kw, (Cout, Cin, ksize, ksize), jnp.float32,
                           -bound, bound)
    b = jax.random.uniform(kb, (Cout,), jnp.float32, -bound, bound)

    for stride in (1, 2):
        out = jax.jit(partial(conv_layer, stride=stride))(x, w, b)
        out = jax.block_until_ready(out)
        ref = conv_layer_ref(x, w, b, stride)
        Ho = (H + 2 * (ksize // 2) - ksize) // stride + 1
        assert out.shape == (B, Cout, Ho, Ho), out.shape
        assert bool(jnp.all(jnp.isfinite(out)))
        # bf16 MXU inputs, f32 accumulation -> loose-but-bug-catching tolerance
        assert float(jnp.max(jnp.abs(out - ref))) < 5e-2

    print("KERNEL_OK")
</pallas_src>

<mosaic_0001>
module attributes {stable_mosaic.version = 11 : i64} {
  func.func @_conv_wide_kernel(%arg0: i32, %arg1: i32, %arg2: memref<1x1x4x183xbf16, #tpu.memory_space<vmem>>, %arg3: memref<9x8x4xbf16, #tpu.memory_space<vmem>>, %arg4: memref<8x1xf32, #tpu.memory_space<vmem>>, %arg5: memref<1x8x128xf32, #tpu.memory_space<vmem>>) attributes {dimension_semantics = [#tpu.dimension_semantics<parallel>, #tpu.dimension_semantics<parallel>], iteration_bounds = array<i64: 2, 2>, scalar_prefetch = 0 : i64, scratch_operands = 0 : i64, tpu.core_type = #tpu.core_type<tc>, window_params = [{transform_indices = @transform_0, window_bounds = array<i64: 1, 1, 4, 183>}, {pipeline_mode = #tpu.pipeline_mode<synchronous>, transform_indices = @transform_1, window_bounds = array<i64: 9, 8, 4>}, {pipeline_mode = #tpu.pipeline_mode<synchronous>, transform_indices = @transform_2, window_bounds = array<i64: 8, 1>}, {transform_indices = @transform_3, window_bounds = array<i64: 1, 8, 128>}]} {
    %c0 = arith.constant 0 : index
    %c0_0 = arith.constant 0 : index
    %c0_1 = arith.constant 0 : index
    %c0_2 = arith.constant 0 : index
    %0 = vector.load %arg2[%c0, %c0_0, %c0_1, %c0_2] : memref<1x1x4x183xbf16, #tpu.memory_space<vmem>>, vector<1x1x4x183xbf16>
    %1 = vector.shape_cast %0 : vector<1x1x4x183xbf16> to vector<4x183xbf16>
    %cst = arith.constant 0.000000e+00 : f32
    %2 = vector.broadcast %cst : f32 to vector<8x144xf32>
    %c0_3 = arith.constant 0 : index
    %c0_4 = arith.constant 0 : index
    %c0_5 = arith.constant 0 : index
    %3 = vector.load %arg3[%c0_3, %c0_4, %c0_5] : memref<9x8x4xbf16, #tpu.memory_space<vmem>>, vector<1x8x4xbf16>
    %4 = vector.shape_cast %3 : vector<1x8x4xbf16> to vector<8x4xbf16>
    %cst_6 = arith.constant dense<0.000000e+00> : vector<8x183xf32>
    %5 = tpu.matmul %4, %1, %cst_6 {dimension_numbers = #tpu.dot_dimension_numbers<[1], [0], [0], [1], [0, 0, 1, 1], [], []>} : vector<8x4xbf16>, vector<4x183xbf16>, vector<8x183xf32> -> vector<8x183xf32>
    %6 = vector.extract_strided_slice %5 {offsets = [0, 0], sizes = [8, 144], strides = [1, 1]} : vector<8x183xf32> to vector<8x144xf32>
    %7 = arith.addf %2, %6 : vector<8x144xf32>
    %c1 = arith.constant 1 : index
    %c0_7 = arith.constant 0 : index
    %c0_8 = arith.constant 0 : index
    %8 = vector.load %arg3[%c1, %c0_7, %c0_8] : memref<9x8x4xbf16, #tpu.memory_space<vmem>>, vector<1x8x4xbf16>
    %9 = vector.shape_cast %8 : vector<1x8x4xbf16> to vector<8x4xbf16>
    %cst_9 = arith.constant dense<0.000000e+00> : vector<8x183xf32>
    %10 = tpu.matmul %9, %1, %cst_9 {dimension_numbers = #tpu.dot_dimension_numbers<[1], [0], [0], [1], [0, 0, 1, 1], [], []>} : vector<8x4xbf16>, vector<4x183xbf16>, vector<8x183xf32> -> vector<8x183xf32>
    %11 = vector.extract_strided_slice %10 {offsets = [0, 1], sizes = [8, 144], strides = [1, 1]} : vector<8x183xf32> to vector<8x144xf32>
    %12 = arith.addf %7, %11 : vector<8x144xf32>
    %c2 = arith.constant 2 : index
    %c0_10 = arith.constant 0 : index
    %c0_11 = arith.constant 0 : index
    %13 = vector.load %arg3[%c2, %c0_10, %c0_11] : memref<9x8x4xbf16, #tpu.memory_space<vmem>>, vector<1x8x4xbf16>
    %14 = vector.shape_cast %13 : vector<1x8x4xbf16> to vector<8x4xbf16>
    %cst_12 = arith.constant dense<0.000000e+00> : vector<8x183xf32>
    %15 = tpu.matmul %14, %1, %cst_12 {dimension_numbers = #tpu.dot_dimension_numbers<[1], [0], [0], [1], [0, 0, 1, 1], [], []>} : vector<8x4xbf16>, vector<4x183xbf16>, vector<8x183xf32> -> vector<8x183xf32>
    %16 = vector.extract_strided_slice %15 {offsets = [0, 2], sizes = [8, 144], strides = [1, 1]} : vector<8x183xf32> to vector<8x144xf32>
    %17 = arith.addf %12, %16 : vector<8x144xf32>
    %c3 = arith.constant 3 : index
    %c0_13 = arith.constant 0 : index
    %c0_14 = arith.constant 0 : index
    %18 = vector.load %arg3[%c3, %c0_13, %c0_14] : memref<9x8x4xbf16, #tpu.memory_space<vmem>>, vector<1x8x4xbf16>
    %19 = vector.shape_cast %18 : vector<1x8x4xbf16> to vector<8x4xbf16>
    %cst_15 = arith.constant dense<0.000000e+00> : vector<8x183xf32>
    %20 = tpu.matmul %19, %1, %cst_15 {dimension_numbers = #tpu.dot_dimension_numbers<[1], [0], [0], [1], [0, 0, 1, 1], [], []>} : vector<8x4xbf16>, vector<4x183xbf16>, vector<8x183xf32> -> vector<8x183xf32>
    %21 = vector.extract_strided_slice %20 {offsets = [0, 18], sizes = [8, 144], strides = [1, 1]} : vector<8x183xf32> to vector<8x144xf32>
    %22 = arith.addf %17, %21 : vector<8x144xf32>
    %c4 = arith.constant 4 : index
    %c0_16 = arith.constant 0 : index
    %c0_17 = arith.constant 0 : index
    %23 = vector.load %arg3[%c4, %c0_16, %c0_17] : memref<9x8x4xbf16, #tpu.memory_space<vmem>>, vector<1x8x4xbf16>
    %24 = vector.shape_cast %23 : vector<1x8x4xbf16> to vector<8x4xbf16>
    %cst_18 = arith.constant dense<0.000000e+00> : vector<8x183xf32>
    %25 = tpu.matmul %24, %1, %cst_18 {dimension_numbers = #tpu.dot_dimension_numbers<[1], [0], [0], [1], [0, 0, 1, 1], [], []>} : vector<8x4xbf16>, vector<4x183xbf16>, vector<8x183xf32> -> vector<8x183xf32>
    %26 = vector.extract_strided_slice %25 {offsets = [0, 19], sizes = [8, 144], strides = [1, 1]} : vector<8x183xf32> to vector<8x144xf32>
    %27 = arith.addf %22, %26 : vector<8x144xf32>
    %c5 = arith.constant 5 : index
    %c0_19 = arith.constant 0 : index
    %c0_20 = arith.constant 0 : index
    %28 = vector.load %arg3[%c5, %c0_19, %c0_20] : memref<9x8x4xbf16, #tpu.memory_space<vmem>>, vector<1x8x4xbf16>
    %29 = vector.shape_cast %28 : vector<1x8x4xbf16> to vector<8x4xbf16>
    %cst_21 = arith.constant dense<0.000000e+00> : vector<8x183xf32>
    %30 = tpu.matmul %29, %1, %cst_21 {dimension_numbers = #tpu.dot_dimension_numbers<[1], [0], [0], [1], [0, 0, 1, 1], [], []>} : vector<8x4xbf16>, vector<4x183xbf16>, vector<8x183xf32> -> vector<8x183xf32>
    %31 = vector.extract_strided_slice %30 {offsets = [0, 20], sizes = [8, 144], strides = [1, 1]} : vector<8x183xf32> to vector<8x144xf32>
    %32 = arith.addf %27, %31 : vector<8x144xf32>
    %c6 = arith.constant 6 : index
    %c0_22 = arith.constant 0 : index
    %c0_23 = arith.constant 0 : index
    %33 = vector.load %arg3[%c6, %c0_22, %c0_23] : memref<9x8x4xbf16, #tpu.memory_space<vmem>>, vector<1x8x4xbf16>
    %34 = vector.shape_cast %33 : vector<1x8x4xbf16> to vector<8x4xbf16>
    %cst_24 = arith.constant dense<0.000000e+00> : vector<8x183xf32>
    %35 = tpu.matmul %34, %1, %cst_24 {dimension_numbers = #tpu.dot_dimension_numbers<[1], [0], [0], [1], [0, 0, 1, 1], [], []>} : vector<8x4xbf16>, vector<4x183xbf16>, vector<8x183xf32> -> vector<8x183xf32>
    %36 = vector.extract_strided_slice %35 {offsets = [0, 36], sizes = [8, 144], strides = [1, 1]} : vector<8x183xf32> to vector<8x144xf32>
    %37 = arith.addf %32, %36 : vector<8x144xf32>
    %c7 = arith.constant 7 : index
    %c0_25 = arith.constant 0 : index
    %c0_26 = arith.constant 0 : index
    %38 = vector.load %arg3[%c7, %c0_25, %c0_26] : memref<9x8x4xbf16, #tpu.memory_space<vmem>>, vector<1x8x4xbf16>
    %39 = vector.shape_cast %38 : vector<1x8x4xbf16> to vector<8x4xbf16>
    %cst_27 = arith.constant dense<0.000000e+00> : vector<8x183xf32>
    %40 = tpu.matmul %39, %1, %cst_27 {dimension_numbers = #tpu.dot_dimension_numbers<[1], [0], [0], [1], [0, 0, 1, 1], [], []>} : vector<8x4xbf16>, vector<4x183xbf16>, vector<8x183xf32> -> vector<8x183xf32>
    %41 = vector.extract_strided_slice %40 {offsets = [0, 37], sizes = [8, 144], strides = [1, 1]} : vector<8x183xf32> to vector<8x144xf32>
    %42 = arith.addf %37, %41 : vector<8x144xf32>
    %c8 = arith.constant 8 : index
    %c0_28 = arith.constant 0 : index
    %c0_29 = arith.constant 0 : index
    %43 = vector.load %arg3[%c8, %c0_28, %c0_29] : memref<9x8x4xbf16, #tpu.memory_space<vmem>>, vector<1x8x4xbf16>
    %44 = vector.shape_cast %43 : vector<1x8x4xbf16> to vector<8x4xbf16>
    %cst_30 = arith.constant dense<0.000000e+00> : vector<8x183xf32>
    %45 = tpu.matmul %44, %1, %cst_30 {dimension_numbers = #tpu.dot_dimension_numbers<[1], [0], [0], [1], [0, 0, 1, 1], [], []>} : vector<8x4xbf16>, vector<4x183xbf16>, vector<8x183xf32> -> vector<8x183xf32>
    %46 = vector.extract_strided_slice %45 {offsets = [0, 38], sizes = [8, 144], strides = [1, 1]} : vector<8x183xf32> to vector<8x144xf32>
    %47 = arith.addf %42, %46 : vector<8x144xf32>
    %48 = vector.extract_strided_slice %47 {offsets = [0, 0], sizes = [8, 16], strides = [1, 1]} : vector<8x144xf32> to vector<8x16xf32>
    %49 = vector.extract_strided_slice %47 {offsets = [0, 18], sizes = [8, 16], strides = [1, 1]} : vector<8x144xf32> to vector<8x16xf32>
    %50 = vector.extract_strided_slice %47 {offsets = [0, 36], sizes = [8, 16], strides = [1, 1]} : vector<8x144xf32> to vector<8x16xf32>
    %51 = vector.extract_strided_slice %47 {offsets = [0, 54], sizes = [8, 16], strides = [1, 1]} : vector<8x144xf32> to vector<8x16xf32>
    %52 = vector.extract_strided_slice %47 {offsets = [0, 72], sizes = [8, 16], strides = [1, 1]} : vector<8x144xf32> to vector<8x16xf32>
    %53 = vector.extract_strided_slice %47 {offsets = [0, 90], sizes = [8, 16], strides = [1, 1]} : vector<8x144xf32> to vector<8x16xf32>
    %54 = vector.extract_strided_slice %47 {offsets = [0, 108], sizes = [8, 16], strides = [1, 1]} : vector<8x144xf32> to vector<8x16xf32>
    %55 = vector.extract_strided_slice %47 {offsets = [0, 126], sizes = [8, 16], strides = [1, 1]} : vector<8x144xf32> to vector<8x16xf32>
    %56 = tpu.concatenate %48, %49, %50, %51, %52, %53, %54, %55 in 1 : vector<8x16xf32>, vector<8x16xf32>, vector<8x16xf32>, vector<8x16xf32>, vector<8x16xf32>, vector<8x16xf32>, vector<8x16xf32>, vector<8x16xf32> -> vector<8x128xf32>
    %c0_31 = arith.constant 0 : index
    %c0_32 = arith.constant 0 : index
    %57 = vector.load %arg4[%c0_31, %c0_32] : memref<8x1xf32, #tpu.memory_space<vmem>>, vector<8x1xf32>
    %58 = vector.broadcast %57 : vector<8x1xf32> to vector<8x128xf32>
    %59 = arith.addf %56, %58 : vector<8x128xf32>
    %c0_33 = arith.constant 0 : index
    %c0_34 = arith.constant 0 : index
    %c0_35 = arith.constant 0 : index
    %60 = vector.load %arg5[%c0_33, %c0_34, %c0_35] : memref<1x8x128xf32, #tpu.memory_space<vmem>>, vector<1x8x128xf32>
    %61 = vector.shape_cast %60 : vector<1x8x128xf32> to vector<8x128xf32>
    %62 = vector.shape_cast %59 : vector<8x128xf32> to vector<1x8x128xf32>
    tpu.vector_store %arg5[%c0_33, %c0_34, %c0_35], %62 {strides = array<i32>} : memref<1x8x128xf32, #tpu.memory_space<vmem>>, vector<1x8x128xf32>,
    return
  }
  func.func @transform_0(%arg0: i32, %arg1: i32) -> (i32, i32, i32, i32) {
    %c0_i32 = arith.constant 0 : i32
    %c0_i32_0 = arith.constant 0 : i32
    %c0_i32_1 = arith.constant 0 : i32
    return %arg0, %arg1, %c0_i32, %c0_i32_0 : i32, i32, i32, i32
  }
  func.func @transform_1(%arg0: i32, %arg1: i32) -> (i32, i32, i32) {
    %c0_i32 = arith.constant 0 : i32
    %c0_i32_0 = arith.constant 0 : i32
    %c0_i32_1 = arith.constant 0 : i32
    %c0_i32_2 = arith.constant 0 : i32
    return %c0_i32, %c0_i32_0, %c0_i32_1 : i32, i32, i32
  }
  func.func @transform_2(%arg0: i32, %arg1: i32) -> (i32, i32) {
    %c0_i32 = arith.constant 0 : i32
    %c0_i32_0 = arith.constant 0 : i32
    %c0_i32_1 = arith.constant 0 : i32
    return %c0_i32, %c0_i32_0 : i32, i32
  }
  func.func @transform_3(%arg0: i32, %arg1: i32) -> (i32, i32, i32) {
    %c0_i32 = arith.constant 0 : i32
    %c0_i32_0 = arith.constant 0 : i32
    return %arg0, %c0_i32, %arg1 : i32, i32, i32
  }
}

</mosaic_0001>

<bundles_post_ra>
// kernel: conv_layer.1
= control target key start
LH: loop header
LB: loop body
LE: loop exit
PB: predicated region body
PF: predicated region fallthrough
CT: control target
= control target key end

     0   :  { %s1044_s12 = smov 0   ;;  %s1046_s13 = smov 0   ;;  %s1161_s0 = inlined_call_operand.vmem [shape: bf16[2,2,4,183], index: 0, kind: input, shape index: {}]   ;;  %s1162_s1 = inlined_call_operand.vmem [shape: bf16[9,8,4], index: 1, kind: input, shape index: {}]   ;;  %s1163_s2 = inlined_call_operand.vmem [shape: f32[8,1], index: 2, kind: input, shape index: {}]   ;;  %s1164_s3 = inlined_call_operand.vmem [shape: f32[2,8,256], index: 3, kind: output, shape index: {}]  }
   0x1   :  { %s1048_s14 = smov 0   ;;  %s1050_s15 = smov 0  }
   0x2   :  { %s1052_s16 = smov 0  }
   0x3 LB: > { %s22_s17 = sadd.s32 1, %s999_s14  ;;  %s25_s18 = sadd.s32 1, %s1003_s15  ;;  %s1007_s16 = sphi %s1052_s16, %s13_s16   ;;  %s1003_s15 = sphi %s1050_s15, %s1168_s15   ;;  %s999_s14 = sphi %s1048_s14, %s1167_s14   ;;  %s995_s13 = sphi %s1046_s13, %s1166_s13   ;;  %s991_s12 = sphi %s1044_s12, %s1165_s12  }
   0x4   : > { %p23_p0 = scmp.ge.s32.totalorder %s22_s17, 2  ;;  %p877_p1 = scmp.ge.s32.totalorder %s1007_s16, 1 }
   0x5   : > { %p157_p2 = scmp.lt.s32.totalorder %s1007_s16, 5 }
   0x6   : > { %s1170_s17 = smov (%p23_p0, %s22_s17), 0  ;;  %s1172_s18 = smov (!%p23_p0, %s25_s18), %s1003_s15 }
   0x7   : > { %p158_p3 = pnand %p877_p1, %p157_p2  ;;  %p27_p4 = scmp.ge.s32.totalorder %s1172_s18, 2 }
   0x8   : > { %p188_p5 = scmp.lt.s32.totalorder (!%p158_p3), %s995_s13, 1  ;;  %p190_p6 = scmp.lt.s32.totalorder (!%p158_p3), %s991_s12, 1 }
   0x9   : > { %s1174_s18 = smov (%p27_p4, %s1172_s18), 0  ;;  %161 = sbr.rel (%p158_p3) target bundleno = 509 (0x1fd), region = 32 }
   0xa   : > { %s1010_s24 = smov (!%p158_p3), 127   ;;  %s1012_s26 = smov (!%p158_p3), 110  }
   0xb   : > { %s1013_s27 = smov (!%p158_p3), 109   ;;  %s1014_s28 = smov (!%p158_p3), 108  }
   0xc   : > { %s1015_s29 = smov (!%p158_p3), 92   ;;  %s1016_s30 = smov (!%p158_p3), 91  }
   0xd   : > { %s1017_s4 = smov (!%p158_p3), 90   ;;  %s1018_s7 = smov (!%p158_p3), 124  }
   0xe   : > { %v1009_v0 = vmov 0   ;;  %s1176_s13 = smov (!%p188_p5, %s995_s13), 1  ;;  %s1178_s12 = smov (!%p190_p6, %s991_s12), 1  ;;  %vm221_vm0 = vcmask 1041408   ;;  %v207_v4 = vld [vmem:[%s1162_s1] sm:$0xf] }
   0xf   : > { %260 = vmatprep.mubr.bf16.mxu0 %v1009_v0  ;;  %308 = vmatprep.mubr.bf16.mxu1 %v1009_v0  ;;  %s879_s19 = sshll.u32 %s1176_s13, 2  ;;  %s878_s20 = sshll.u32 %s1178_s12, 1  ;;  %vm217_vm1 = vcmask 31744   ;;  %v886_v5 = vld [vmem:[%s1162_s1 + $0x4] sm:$0xf]  ;;  %vm323_vm2 = vcmask 1039360  }
  0x10   : > { %967 = vset.pattern.permute.xlu1 %v1009_v0  ;;  %968 = vset.pattern.permute.xlu0 %v1009_v0  ;;  %s194_s21 = sadd.s32 %s879_s19, %s878_s20  ;;  %v889_v6 = vld [vmem:[%s1162_s1 + $0x8] sm:$0xf]  ;;  %v892_v7 = vld [vmem:[%s1162_s1 + $0xc] sm:$0xf]  ;;  %v895_v8 = vld [vmem:[%s1162_s1 + $0x10] sm:$0xf] }
  0x11   : > { %s880_s22 = sshll.u32 %s194_s21, 1  ;;  %v898_v9 = vld [vmem:[%s1162_s1 + $0x14] sm:$0xf]  ;;  %v901_v10 = vld [vmem:[%s1162_s1 + $0x18] sm:$0xf]  ;;  %v776_v49 = vld [vmem:[%s1163_s2] sm:$0xff] }
  0x12   : > { %s196_s25 = scalar_lea.vmem %s1161_s0, %s880_s22  ;;  %v904_v11 = vld [vmem:[%s1162_s1 + $0x1c] sm:$0xf]  ;;  %v907_v12 = vld [vmem:[%s1162_s1 + $0x20] sm:$0xf]  ;;  %vm381_vm3 = vcmask 1031168   ;;  %vm439_vm4 = vcmask 900096  }
  0x13   : > { %v883_v1 = vld.sshfl [vmem:[%s196_s25] sm:$0x33 pattern:$0x76325410]  ;;  %s1011_s25 = smov 126   ;;  %vm497_vm5 = vcmask 891904  }
  0x14   : > { %v216_v2 = vcombine.high %v883_v1, %v883_v1  ;;  %v223_v3 = vsel %vm221_vm0, %v883_v1, 0  ;;  %vm555_vm6 = vcmask 883712   ;;  %vm613_vm7 = vcmask 752640   ;;  %s1019_s8 = smov 118   ;;  %s1020_s9 = smov 122  }
  0x15   : > { %vm671_vm8 = vcmask 744448   ;;  %vm729_vm9 = vcmask 736256   ;;  %s1021_s10 = smov 114   ;;  %s1022_s11 = smov 120   ;;  %vm762_vm10 = vcmask 130048   ;;  %vm764_vm11 = vcmask 261120  }
  0x16   : > { %884 = vmatprep.subr.msk.bf16.mxu0 %vm221_vm0, %v216_v2  ;;  %887 = vmatprep.subr.msk.bf16.mxu1 %vm221_vm0, %v216_v2  ;;  %s1023_s19 = smov 116   ;;  %vm766_vm12 = vcmask 392192   ;;  %s881_s20 = sshll.u32 %s1176_s13, 1  ;;  %vm768_vm13 = vcmask 523264   ;;  %vm770_vm14 = vcmask 654336   ;;  %vm772_vm15 = vcmask 785408  }
  0x17   : > { %243 = vmatpush1.bf16.msra.mxu0 %v223_v3  ;;  %291 = vmatpush1.bf16.msra.mxu1 %v223_v3  ;;  %s202_s21 = sadd.s32 %s881_s20, %s1178_s12 }
  0x18   : > { %890 = vmatprep.subr.msk.bf16.mxu0 %vm221_vm0, %v216_v2  ;;  %893 = vmatprep.subr.msk.bf16.mxu1 %vm221_vm0, %v216_v2  ;;  %s882_s22 = sshll.u32 %s202_s21, 3 }
  0x19   : > { %s204_s13 = scalar_lea.vmem %s1164_s3, %s882_s22 }
  0x1a   : > { %885 = vmatmul.mubr.msk.bf16.vlgmr.msra.gmra.mxu0 %vm217_vm1, %v207_v4  ;;  %888 = vmatmul.mubr.msk.bf16.vlgmr.msra.gmra.mxu1 %vm217_vm1, %v886_v5 }
  0x1b   : > { %349 = vmatpush1.bf16.msra.mxu0 %v223_v3  ;;  %407 = vmatpush1.bf16.msra.mxu1 %v223_v3 }
  0x1c   : > { %366 = vmatprep.mubr.bf16.mxu0 %v1009_v0  ;;  %424 = vmatprep.mubr.bf16.mxu1 %v1009_v0 }
  0x1d   : > { %896 = vmatprep.subr.msk.bf16.mxu0 %vm221_vm0, %v216_v2  ;;  %899 = vmatprep.subr.msk.bf16.mxu1 %vm221_vm0, %v216_v2 }
  0x22   : > { %891 = vmatmul.mubr.msk.bf16.vlgmr.msra.gmra.mxu0 %vm217_vm1, %v889_v6  ;;  %894 = vmatmul.mubr.msk.bf16.vlgmr.msra.gmra.mxu1 %vm217_vm1, %v892_v7 }
  0x23   : > { %465 = vmatpush1.bf16.msra.mxu0 %v223_v3  ;;  %523 = vmatpush1.bf16.msra.mxu1 %v223_v3 }
  0x24   : > { %482 = vmatprep.mubr.bf16.mxu0 %v1009_v0  ;;  %540 = vmatprep.mubr.bf16.mxu1 %v1009_v0 }
  0x25   : > { %902 = vmatprep.subr.msk.bf16.mxu0 %vm221_vm0, %v216_v2  ;;  %905 = vmatprep.subr.msk.bf16.mxu1 %vm221_vm0, %v216_v2 }
  0x2a   : > { %897 = vmatmul.mubr.msk.bf16.vlgmr.msra.gmra.mxu0 %vm217_vm1, %v895_v8  ;;  %900 = vmatmul.mubr.msk.bf16.vlgmr.msra.gmra.mxu1 %vm217_vm1, %v898_v9 }
  0x2b   : > { %581 = vmatpush1.bf16.msra.mxu0 %v223_v3  ;;  %639 = vmatpush1.bf16.msra.mxu1 %v223_v3 }
  0x2c   : > { %598 = vmatprep.mubr.bf16.mxu0 %v1009_v0  ;;  %656 = vmatprep.mubr.bf16.mxu1 %v1009_v0 }
  0x2d   : > { %908 = vmatprep.subr.msk.bf16.mxu0 %vm221_vm0, %v216_v2  ;;  %vm759_vm0 = vcmask 932864  }
  0x32   : > { %903 = vmatmul.mubr.msk.bf16.vlgmr.msra.gmra.mxu0 %vm217_vm1, %v901_v10  ;;  %906 = vmatmul.mubr.msk.bf16.vlgmr.msra.gmra.mxu1 %vm217_vm1, %v904_v11 }
  0x33   : > { %697 = vmatpush1.bf16.msra.mxu0 %v223_v3  ;;  %714 = vmatprep.mubr.bf16.mxu0 %v1009_v0 }
  0x3a   : > { %909 = vmatmul.mubr.msk.bf16.vlgmr.msra.gmra.mxu0 %vm217_vm1, %v907_v12  ;;  %vm774_vm1 = vcmask 916480  }
  0xda   : > { %v1129_v13 = vpop.f32.mrf.mxu0  ;;  %v310_v14 = vpop.f32.mrf.mxu1 }
  0xdb   : > { %319 = vrot.lane.b32.xlu0 %v310_v14, %s1010_s24 }
  0xdc   : > { %v1131_v15 = vpop.f32.mrf.mxu0  ;;  %v312_v16 = vpop.f32.mrf.mxu1 }
  0xde   : > { %v266_v17 = vpop.f32.mrf.mxu0  ;;  %v314_v18 = vpop.f32.mrf.mxu1 }
  0xdf   : > { %321 = vrot.lane.b32.xlu0 %v312_v16, %s1010_s24 }
  0xe0   : > { %v267_v19 = vpop.f32.mrf.mxu0  ;;  %v315_v20 = vpop.f32.mrf.mxu1 }
  0xe2   : > { %v368_v21 = vpop.f32.mrf.mxu0  ;;  %v426_v22 = vpop.f32.mrf.mxu1 }
  0xe3   : > { %377 = vrot.lane.b32.xlu1 %v368_v21, %s1011_s25  ;;  %435 = vrot.lane.b32.xlu0 %v426_v22, %s1012_s26 }
  0xe4   : > { %v370_v23 = vpop.f32.mrf.mxu0  ;;  %v428_v24 = vpop.f32.mrf.mxu1 }
  0xe6   : > { %v372_v25 = vpop.f32.mrf.mxu0  ;;  %v430_v26 = vpop.f32.mrf.mxu1 }
  0xe7   : > { %379 = vrot.lane.b32.xlu1 %v370_v23, %s1011_s25 }
  0xe8   : > { %v373_v27 = vpop.f32.mrf.mxu0  ;;  %v431_v28 = vpop.f32.mrf.mxu1 }
  0xea   : > { %v484_v29 = vpop.f32.mrf.mxu0  ;;  %v542_v30 = vpop.f32.mrf.mxu1 }
  0xeb   : > { %437 = vrot.lane.b32.xlu1 %v428_v24, %s1012_s26  ;;  %493 = vrot.lane.b32.xlu0 %v484_v29, %s1013_s27 }
  0xec   : > { %v486_v31 = vpop.f32.mrf.mxu0  ;;  %v544_v32 = vpop.f32.mrf.mxu1 }
  0xee   : > { %v488_v33 = vpop.f32.mrf.mxu0  ;;  %v546_v34 = vpop.f32.mrf.mxu1 }
  0xef   : > { %495 = vrot.lane.b32.xlu1 %v486_v31, %s1013_s27  ;;  %551 = vrot.lane.b32.xlu0 %v542_v30, %s1014_s28 }
  0xf0   : > { %v489_v35 = vpop.f32.mrf.mxu0  ;;  %v547_v36 = vpop.f32.mrf.mxu1 }
  0xf2   : > { %v600_v37 = vpop.f32.mrf.mxu0  ;;  %v658_v38 = vpop.f32.mrf.mxu1 }
  0xf3   : > { %553 = vrot.lane.b32.xlu1 %v544_v32, %s1014_s28  ;;  %609 = vrot.lane.b32.xlu0 %v600_v37, %s1015_s29 }
  0xf4   : > { %v602_v39 = vpop.f32.mrf.mxu0  ;;  %v660_v40 = vpop.f32.mrf.mxu1 }
  0xf6   : > { %v604_v41 = vpop.f32.mrf.mxu0  ;;  %v662_v42 = vpop.f32.mrf.mxu1 }
  0xf7   : > { %611 = vrot.lane.b32.xlu1 %v602_v39, %s1015_s29  ;;  %667 = vrot.lane.b32.xlu0 %v658_v38, %s1016_s30 }
  0xf8   : > { %v605_v43 = vpop.f32.mrf.mxu0  ;;  %v663_v44 = vpop.f32.mrf.mxu1 }
  0xfa   : > { %v716_v45 = vpop.f32.mrf.mxu0 }
  0xfb   : > { %669 = vrot.lane.b32.xlu1 %v660_v40, %s1016_s30  ;;  %725 = vrot.lane.b32.xlu0 %v716_v45, %s1017_s4 }
  0xfc   : > { %v718_v46 = vpop.f32.mrf.mxu0 }
  0xfe   : > { %v720_v47 = vpop.f32.mrf.mxu0 }
  0xff   : > { %727 = vrot.lane.b32.xlu1 %v718_v46, %s1017_s4 }
 0x100   : > { %v721_v48 = vpop.f32.mrf.mxu0 }
 0x103   : > { %779 = vperm.xlu1 %967, %v776_v49  }
 0x14d   : > { %v320_v50 = vpop.permute.xlu0 %319 }
 0x151   : > { %v322_v51 = vpop.permute.xlu0 %321 }
 0x152   : > { %v324_v59 = vsel %vm323_vm2, %v320_v50, %v322_v51  ;;  %v328_v19 = vadd.f32 %v322_v51, %v1131_v15 }
 0x153   : > { %v327_v61 = vadd.f32 %v324_v59, %v1129_v13 }
 0x155   : > { %v378_v52 = vpop.permute.xlu1 %377  ;;  %v436_v53 = vpop.permute.xlu0 %435 }
 0x159   : > { %v380_v54 = vpop.permute.xlu1 %379 }
 0x15a   : > { %v382_v60 = vsel %vm381_vm3, %v378_v52, %v380_v54  ;;  %v386_v20 = vadd.f32 %v380_v54, %v328_v19 }
 0x15b   : > { %v385_v1 = vadd.f32 %v382_v60, %v327_v61 }
 0x15d   : > { %v438_v55 = vpop.permute.xlu1 %437  ;;  %v494_v56 = vpop.permute.xlu0 %493 }
 0x15e   : > { %v440_v0 = vsel %vm439_vm4, %v436_v53, %v438_v55  ;;  %v444_v21 = vadd.f32 %v438_v55, %v386_v20 }
 0x15f   : > { %v443_v3 = vadd.f32 %v440_v0, %v385_v1 }
 0x161   : > { %v496_v57 = vpop.permute.xlu1 %495  ;;  %v552_v58 = vpop.permute.xlu0 %551 }
 0x162   : > { %v498_v2 = vsel %vm497_vm5, %v494_v56, %v496_v57  ;;  %v502_v22 = vadd.f32 %v496_v57, %v444_v21 }
 0x163   : > { %v501_v6 = vadd.f32 %v498_v2, %v443_v3 }
 0x165   : > { %v554_v62 = vpop.permute.xlu1 %553  ;;  %v610_v63 = vpop.permute.xlu0 %609 }
 0x166   : > { %v556_v5 = vsel %vm555_vm6, %v552_v58, %v554_v62  ;;  %v560_v23 = vadd.f32 %v554_v62, %v502_v22 }
 0x167   : > { %v559_v9 = vadd.f32 %v556_v5, %v501_v6 }
 0x169   : > { %v612_v4 = vpop.permute.xlu1 %611  ;;  %v668_v7 = vpop.permute.xlu0 %667 }
 0x16a   : > { %v614_v8 = vsel %vm613_vm7, %v610_v63, %v612_v4  ;;  %v618_v24 = vadd.f32 %v612_v4, %v560_v23 }
 0x16b   : > { %v617_v12 = vadd.f32 %v614_v8, %v559_v9 }
 0x16d   : > { %v670_v10 = vpop.permute.xlu1 %669  ;;  %v726_v14 = vpop.permute.xlu0 %725 }
 0x16e   : > { %v672_v11 = vsel %vm671_vm8, %v668_v7, %v670_v10  ;;  %v676_v25 = vadd.f32 %v670_v10, %v618_v24 }
 0x16f   : > { %v675_v13 = vadd.f32 %v672_v11, %v617_v12 }
 0x171   : > { %v728_v16 = vpop.permute.xlu1 %727 }
 0x172   : > { %v730_v17 = vsel %vm729_vm9, %v726_v14, %v728_v16  ;;  %v734_v15 = vadd.f32 %v728_v16, %v676_v25 }
 0x173   : > { %v733_v18 = vadd.f32 %v730_v17, %v675_v13 }
 0x175   : > { %739 = vrot.lane.b32.xlu1 %v733_v18, %s1018_s7  ;;  %736 = vrot.lane.b32.xlu0 %v733_v18, %s1011_s25 }
 0x179   : > { %748 = vrot.lane.b32.xlu1 %v733_v18, %s1019_s8  ;;  %742 = vrot.lane.b32.xlu0 %v733_v18, %s1020_s9 }
 0x17d   : > { %755 = vrot.lane.b32.xlu1 %v733_v18, %s1021_s10  ;;  %745 = vrot.lane.b32.xlu0 %v733_v18, %s1022_s11 }
 0x17e   : > { %v780_v26 = vpop.permute.xlu1 %779 }
 0x181   : > { %751 = vrot.lane.b32.xlu0 %v733_v18, %s1023_s19 }
 0x185   : > { %757 = vrot.lane.b32.xlu0 %v734_v15, %s1021_s10 }
 0x1e7   : > { %v737_v27 = vpop.permute.xlu0 %736  ;;  %v740_v28 = vpop.permute.xlu1 %739 }
 0x1e8   : > { %v763_v30 = vsel %vm762_vm10, %v733_v18, %v737_v27 }
 0x1e9   : > { %v765_v33 = vsel %vm764_vm11, %v763_v30, %v740_v28 }
 0x1eb   : > { %v743_v29 = vpop.permute.xlu0 %742  ;;  %v749_v32 = vpop.permute.xlu1 %748 }
 0x1ec   : > { %v767_v34 = vsel %vm766_vm12, %v765_v33, %v743_v29 }
 0x1ef   : > { %v746_v31 = vpop.permute.xlu0 %745  ;;  %v756_v37 = vpop.permute.xlu1 %755 }
 0x1f0   : > { %v769_v36 = vsel %vm768_vm13, %v767_v34, %v746_v31 }
 0x1f1   : > { %v771_v38 = vsel %vm770_vm14, %v769_v36, %v749_v32 }
 0x1f3   : > { %v752_v35 = vpop.permute.xlu0 %751 }
 0x1f4   : > { %v773_v40 = vsel %vm772_vm15, %v771_v38, %v752_v35 }
 0x1f7   : > { %v758_v39 = vpop.permute.xlu0 %757 }
 0x1f8   : > { %v760_v41 = vsel %vm759_vm0, %v756_v37, %v758_v39 }
 0x1f9   : > { %v775_v42 = vsel %vm774_vm1, %v773_v40, %v760_v41 }
 0x1fa   : > { %v782_v43 = vadd.f32 %v780_v26, %v775_v42 }
 0x1fc   : > { %783 = vst [vmem:[%s204_s13] sm:$0xff] %v782_v43 }
 0x1fd PF: > { %s13_s16 = sadd.s32 1, %s1007_s16   ;;  %s1165_s12 = smov %s999_s14 }
 0x1fe   : > { %p10_p7 = scmp.ge.s32.totalorder %s13_s16, 6   ;;  %s1166_s13 = smov %s1003_s15 }
 0x1ff   : > { %s1167_s14 = smov %s1170_s17  ;;  %s1168_s15 = smov %s1174_s18 }
 0x200   :  { %12 = sbr.rel (!%p10_p7) target bundleno = 3 (0x3), region = 70 }

</bundles_post_ra>
